<compile_context>
chip_gen: v7x
topology: tpu7x:2x2x1
jax: 0.10.0
libtpu: 0.0.40
codegen_flags: <defaults>
</compile_context>

<pallas_src>
import jax
import jax.numpy as jnp
from jax.experimental import pallas as pl
from jax.experimental.pallas import tpu as pltpu

HIDDEN1 = 128
HIDDEN2 = 64


def _round_up(n, m):
    return ((n + m - 1) // m) * m


def dnn_kernel(x_ref, w1_ref, b1_ref, w2_ref, b2_ref, w3_ref, b3_ref, o_ref):
    cd = w1_ref.dtype  # MXU input dtype (bf16); accumulation is always f32
    # Cast x in-kernel (hidden under DMA/MXU) rather than as a wrapper XLA pass.
    x = x_ref[...].astype(cd)
    # layer 1: MXU matmul, f32 bias + ReLU on the VPU
    h1 = jnp.dot(x, w1_ref[...], preferred_element_type=jnp.float32)
    h1 = jnp.maximum(h1 + b1_ref[...], 0.0)
    # layer 2
    h2 = jnp.dot(h1.astype(cd), w2_ref[...], preferred_element_type=jnp.float32)
    h2 = jnp.maximum(h2 + b2_ref[...], 0.0)
    # layer 3 (no activation), written at the true output width
    out = jnp.dot(h2.astype(cd), w3_ref[...], preferred_element_type=jnp.float32)
    o_ref[...] = (out + b3_ref[...]).astype(o_ref.dtype)


def _pick_batch_tile(B, sublane, max_tile=512):
    """Single tile for tiny B; otherwise an even tile count >= 2 with <= max_tile rows."""
    if B <= max(32, sublane):
        return B  # block dim == full array dim -> always a legal BlockSpec
    n_tiles = pl.cdiv(B, max_tile)
    if n_tiles % 2:
        n_tiles += 1  # even tile count so v7x's two TensorCores both get work
    return _round_up(pl.cdiv(B, n_tiles), sublane)


def dnn_forward(x, params, *, batch_tile=None, compute_dtype=jnp.bfloat16):
    w1, b1, w2, b2, w3, b3 = params
    B, F = x.shape
    out_size = w3.shape[1]

    # Sublane tiling of the input dtype (8 for f32, 16 for bf16, ...).
    sublane = max(8, 32 // jnp.dtype(x.dtype).itemsize)
    if batch_tile is None:
        tb = _pick_batch_tile(B, sublane)
    else:
        tb = min(_round_up(batch_tile, sublane), _round_up(B, sublane))
    num_tiles = pl.cdiv(B, tb)

    def cast(w):  # no-op when params were prepared (pre-cast) once
        return w if w.dtype == compute_dtype else w.astype(compute_dtype)

    w1c, w2c, w3c = cast(w1), cast(w2), cast(w3)
    b1f = b1.astype(jnp.float32)
    b2f = b2.astype(jnp.float32)
    b3f = b3.astype(jnp.float32)

    def resident(shape):
        # Same block every grid step -> loaded into VMEM once, reused.
        return pl.BlockSpec(shape, lambda i: (0,) * len(shape))

    out = pl.pallas_call(
        dnn_kernel,
        out_shape=jax.ShapeDtypeStruct((B, out_size), jnp.float32),
        grid=(num_tiles,),
        in_specs=[
            pl.BlockSpec((tb, F), lambda i: (i, 0)),
            resident(w1c.shape), resident(b1f.shape),
            resident(w2c.shape), resident(b2f.shape),
            resident(w3c.shape), resident(b3f.shape),
        ],
        out_specs=pl.BlockSpec((tb, out_size), lambda i: (i, 0)),
        compiler_params=pltpu.CompilerParams(
            dimension_semantics=("parallel",),  # shard batch tiles across TCs (v7x)
        ),
    )(x, w1c, b1f, w2c, b2f, w3c, b3f)

    return out


def init_params(key, input_size, output_size):
    """Deterministic init mimicking PyTorch's default U(-1/sqrt(fan_in), +1/sqrt(fan_in))."""
    ks = jax.random.split(key, 6)

    def linear(kw, kb, fan_in, fan_out):
        bound = 1.0 / jnp.sqrt(jnp.float32(fan_in))
        w = jax.random.uniform(kw, (fan_in, fan_out), jnp.float32, -bound, bound)
        b = jax.random.uniform(kb, (1, fan_out), jnp.float32, -bound, bound)
        return w, b

    w1, b1 = linear(ks[0], ks[1], input_size, HIDDEN1)
    w2, b2 = linear(ks[2], ks[3], HIDDEN1, HIDDEN2)
    w3, b3 = linear(ks[4], ks[5], HIDDEN2, output_size)
    return (w1, b1, w2, b2, w3, b3)


def prepare_params(params, compute_dtype=jnp.bfloat16):
    """One-time weight cast so per-call casts in dnn_forward are no-ops (biases stay f32)."""
    w1, b1, w2, b2, w3, b3 = params
    return (w1.astype(compute_dtype), b1,
            w2.astype(compute_dtype), b2,
            w3.astype(compute_dtype), b3)


def dnn_reference(x, params, compute_dtype=jnp.float32):
    """Pure-JAX reference; compute_dtype mirrors the kernel's MXU input dtype."""
    w1, b1, w2, b2, w3, b3 = params
    cd = compute_dtype
    h1 = jnp.maximum(
        jnp.dot(x.astype(cd), w1.astype(cd), preferred_element_type=jnp.float32)
        + b1.astype(jnp.float32), 0.0)
    h2 = jnp.maximum(
        jnp.dot(h1.astype(cd), w2.astype(cd), preferred_element_type=jnp.float32)
        + b2.astype(jnp.float32), 0.0)
    return (jnp.dot(h2.astype(cd), w3.astype(cd), preferred_element_type=jnp.float32)
            + b3.astype(jnp.float32))


if __name__ == "__main__":
    key = jax.random.PRNGKey(0)
    kx, kp = jax.random.split(key)

    batch = 8
    input_size = 32
    output_size = 16

    x = jax.random.normal(kx, (batch, input_size), jnp.float32)
    params_f32 = init_params(kp, input_size, output_size)
    params = prepare_params(params_f32)  # pre-cast weights to bf16 once

    out = jax.block_until_ready(dnn_forward(x, params))
    assert out.shape == (batch, output_size)

    # Check vs a reference that uses the same bf16-in / f32-accumulate arithmetic.
    ref_bf16 = dnn_reference(x, params_f32, compute_dtype=jnp.bfloat16)
    assert jnp.allclose(out, ref_bf16, atol=5e-3, rtol=5e-3), "mismatch vs bf16 reference"

    # Sanity check vs the full-f32 reference (bf16 MXU inputs cost ~1% accuracy).
    ref_f32 = dnn_reference(x, params_f32, compute_dtype=jnp.float32)
    assert jnp.allclose(out, ref_f32, atol=5e-2, rtol=5e-2), "mismatch vs f32 reference"

    # Second case: batch not a multiple of the tile, exercising the even-tile
    # parallel grid (2 x 152 rows) and the masked final partial block.
    x2 = jax.random.normal(jax.random.fold_in(kx, 1), (300, input_size), jnp.float32)
    out2 = jax.block_until_ready(dnn_forward(x2, params))
    assert out2.shape == (300, output_size)
    ref2 = dnn_reference(x2, params_f32, compute_dtype=jnp.bfloat16)
    assert jnp.allclose(out2, ref2, atol=5e-3, rtol=5e-3), "mismatch vs reference (tiled batch)"

    # Third case: explicit (non-aligned) user tile -> rounded up to the sublane tiling.
    out3 = jax.block_until_ready(dnn_forward(x2, params, batch_tile=100))
    assert out3.shape == (300, output_size)
    assert jnp.allclose(out3, ref2, atol=5e-3, rtol=5e-3), "mismatch vs reference (custom tile)"

    print("KERNEL_OK")
</pallas_src>

<mosaic_0001>
module attributes {stable_mosaic.version = 11 : i64} {
  func.func @dnn_kernel(%arg0: i32, %arg1: memref<8x32xf32, #tpu.memory_space<vmem>>, %arg2: memref<32x128xbf16, #tpu.memory_space<vmem>>, %arg3: memref<1x128xf32, #tpu.memory_space<vmem>>, %arg4: memref<128x64xbf16, #tpu.memory_space<vmem>>, %arg5: memref<1x64xf32, #tpu.memory_space<vmem>>, %arg6: memref<64x16xbf16, #tpu.memory_space<vmem>>, %arg7: memref<1x16xf32, #tpu.memory_space<vmem>>, %arg8: memref<8x16xf32, #tpu.memory_space<vmem>>) attributes {dimension_semantics = [#tpu.dimension_semantics<parallel>], iteration_bounds = array<i64: 1>, scalar_prefetch = 0 : i64, scratch_operands = 0 : i64, tpu.core_type = #tpu.core_type<tc>, window_params = [{transform_indices = @transform_0, window_bounds = array<i64: 8, 32>}, {pipeline_mode = #tpu.pipeline_mode<synchronous>, transform_indices = @transform_1, window_bounds = array<i64: 32, 128>}, {pipeline_mode = #tpu.pipeline_mode<synchronous>, transform_indices = @transform_2, window_bounds = array<i64: 1, 128>}, {pipeline_mode = #tpu.pipeline_mode<synchronous>, transform_indices = @transform_3, window_bounds = array<i64: 128, 64>}, {pipeline_mode = #tpu.pipeline_mode<synchronous>, transform_indices = @transform_4, window_bounds = array<i64: 1, 64>}, {pipeline_mode = #tpu.pipeline_mode<synchronous>, transform_indices = @transform_5, window_bounds = array<i64: 64, 16>}, {pipeline_mode = #tpu.pipeline_mode<synchronous>, transform_indices = @transform_6, window_bounds = array<i64: 1, 16>}, {transform_indices = @transform_7, window_bounds = array<i64: 8, 16>}]} {
    %c0 = arith.constant 0 : index
    %c0_0 = arith.constant 0 : index
    %0 = vector.load %arg1[%c0, %c0_0] : memref<8x32xf32, #tpu.memory_space<vmem>>, vector<8x32xf32>
    %1 = arith.truncf %0 : vector<8x32xf32> to vector<8x32xbf16>
    %c0_1 = arith.constant 0 : index
    %c0_2 = arith.constant 0 : index
    %2 = vector.load %arg2[%c0_1, %c0_2] : memref<32x128xbf16, #tpu.memory_space<vmem>>, vector<32x128xbf16>
    %cst = arith.constant dense<0.000000e+00> : vector<8x128xf32>
    %3 = tpu.matmul %1, %2, %cst {dimension_numbers = #tpu.dot_dimension_numbers<[1], [0], [0], [1], [0, 0, 1, 1], [], []>} : vector<8x32xbf16>, vector<32x128xbf16>, vector<8x128xf32> -> vector<8x128xf32>
    %c0_3 = arith.constant 0 : index
    %c0_4 = arith.constant 0 : index
    %4 = vector.load %arg3[%c0_3, %c0_4] : memref<1x128xf32, #tpu.memory_space<vmem>>, vector<1x128xf32>
    %5 = vector.broadcast %4 : vector<1x128xf32> to vector<8x128xf32>
    %6 = arith.addf %3, %5 : vector<8x128xf32>
    %cst_5 = arith.constant 0.000000e+00 : f32
    %7 = vector.broadcast %cst_5 : f32 to vector<8x128xf32>
    %8 = arith.maximumf %6, %7 : vector<8x128xf32>
    %9 = arith.truncf %8 : vector<8x128xf32> to vector<8x128xbf16>
    %c0_6 = arith.constant 0 : index
    %c0_7 = arith.constant 0 : index
    %10 = vector.load %arg4[%c0_6, %c0_7] : memref<128x64xbf16, #tpu.memory_space<vmem>>, vector<128x64xbf16>
    %cst_8 = arith.constant dense<0.000000e+00> : vector<8x64xf32>
    %11 = tpu.matmul %9, %10, %cst_8 {dimension_numbers = #tpu.dot_dimension_numbers<[1], [0], [0], [1], [0, 0, 1, 1], [], []>} : vector<8x128xbf16>, vector<128x64xbf16>, vector<8x64xf32> -> vector<8x64xf32>
    %c0_9 = arith.constant 0 : index
    %c0_10 = arith.constant 0 : index
    %12 = vector.load %arg5[%c0_9, %c0_10] : memref<1x64xf32, #tpu.memory_space<vmem>>, vector<1x64xf32>
    %13 = vector.broadcast %12 : vector<1x64xf32> to vector<8x64xf32>
    %14 = arith.addf %11, %13 : vector<8x64xf32>
    %cst_11 = arith.constant 0.000000e+00 : f32
    %15 = vector.broadcast %cst_11 : f32 to vector<8x64xf32>
    %16 = arith.maximumf %14, %15 : vector<8x64xf32>
    %17 = arith.truncf %16 : vector<8x64xf32> to vector<8x64xbf16>
    %c0_12 = arith.constant 0 : index
    %c0_13 = arith.constant 0 : index
    %18 = vector.load %arg6[%c0_12, %c0_13] : memref<64x16xbf16, #tpu.memory_space<vmem>>, vector<64x16xbf16>
    %cst_14 = arith.constant dense<0.000000e+00> : vector<8x16xf32>
    %19 = tpu.matmul %17, %18, %cst_14 {dimension_numbers = #tpu.dot_dimension_numbers<[1], [0], [0], [1], [0, 0, 1, 1], [], []>} : vector<8x64xbf16>, vector<64x16xbf16>, vector<8x16xf32> -> vector<8x16xf32>
    %c0_15 = arith.constant 0 : index
    %c0_16 = arith.constant 0 : index
    %20 = vector.load %arg7[%c0_15, %c0_16] : memref<1x16xf32, #tpu.memory_space<vmem>>, vector<1x16xf32>
    %21 = vector.broadcast %20 : vector<1x16xf32> to vector<8x16xf32>
    %22 = arith.addf %19, %21 : vector<8x16xf32>
    %c0_17 = arith.constant 0 : index
    %c0_18 = arith.constant 0 : index
    %23 = vector.load %arg8[%c0_17, %c0_18] : memref<8x16xf32, #tpu.memory_space<vmem>>, vector<8x16xf32>
    tpu.vector_store %arg8[%c0_17, %c0_18], %22 {strides = array<i32>} : memref<8x16xf32, #tpu.memory_space<vmem>>, vector<8x16xf32>,
    return
  }
  func.func @transform_0(%arg0: i32) -> (i32, i32) {
    %c0_i32 = arith.constant 0 : i32
    %c0_i32_0 = arith.constant 0 : i32
    return %arg0, %c0_i32 : i32, i32
  }
  func.func @transform_1(%arg0: i32) -> (i32, i32) {
    %c0_i32 = arith.constant 0 : i32
    %c0_i32_0 = arith.constant 0 : i32
    %c0_i32_1 = arith.constant 0 : i32
    return %c0_i32, %c0_i32_0 : i32, i32
  }
  func.func @transform_2(%arg0: i32) -> (i32, i32) {
    %c0_i32 = arith.constant 0 : i32
    %c0_i32_0 = arith.constant 0 : i32
    %c0_i32_1 = arith.constant 0 : i32
    return %c0_i32, %c0_i32_0 : i32, i32
  }
  func.func @transform_3(%arg0: i32) -> (i32, i32) {
    %c0_i32 = arith.constant 0 : i32
    %c0_i32_0 = arith.constant 0 : i32
    %c0_i32_1 = arith.constant 0 : i32
    return %c0_i32, %c0_i32_0 : i32, i32
  }
  func.func @transform_4(%arg0: i32) -> (i32, i32) {
    %c0_i32 = arith.constant 0 : i32
    %c0_i32_0 = arith.constant 0 : i32
    %c0_i32_1 = arith.constant 0 : i32
    return %c0_i32, %c0_i32_0 : i32, i32
  }
  func.func @transform_5(%arg0: i32) -> (i32, i32) {
    %c0_i32 = arith.constant 0 : i32
    %c0_i32_0 = arith.constant 0 : i32
    %c0_i32_1 = arith.constant 0 : i32
    return %c0_i32, %c0_i32_0 : i32, i32
  }
  func.func @transform_6(%arg0: i32) -> (i32, i32) {
    %c0_i32 = arith.constant 0 : i32
    %c0_i32_0 = arith.constant 0 : i32
    %c0_i32_1 = arith.constant 0 : i32
    return %c0_i32, %c0_i32_0 : i32, i32
  }
  func.func @transform_7(%arg0: i32) -> (i32, i32) {
    %c0_i32 = arith.constant 0 : i32
    %c0_i32_0 = arith.constant 0 : i32
    return %arg0, %c0_i32 : i32, i32
  }
}

</mosaic_0001>

<bundles_post_ra>
// kernel: tpu_custom_call.1
= control target key start
LH: loop header
LB: loop body
LE: loop exit
PB: predicated region body
PF: predicated region fallthrough
CT: control target
= control target key end

     0   :  { %v428_v1 = vmov 0.0   ;;  %vm429_vm0 = vmmov 0   ;;  %vm53_vm1 = vcmask 261120   ;;  %s540_s0 = inlined_call_operand.vmem [shape: f32[8,32], index: 0, kind: input, shape index: {}]   ;;  %s541_s1 = inlined_call_operand.vmem [shape: bf16[32,128], index: 1, kind: input, shape index: {}]   ;;  %s542_s2 = inlined_call_operand.vmem [shape: f32[1,128], index: 2, kind: input, shape index: {}]   ;;  %s543_s3 = inlined_call_operand.vmem [shape: bf16[128,64], index: 3, kind: input, shape index: {}]   ;;  %s544_s4 = inlined_call_operand.vmem [shape: f32[1,64], index: 4, kind: input, shape index: {}]   ;;  %s545_s5 = inlined_call_operand.vmem [shape: bf16[64,16], index: 5, kind: input, shape index: {}]   ;;  %s546_s6 = inlined_call_operand.vmem [shape: f32[1,16], index: 6, kind: input, shape index: {}]   ;;  %s547_s7 = inlined_call_operand.hbm [shape: f32[8,16], index: 7, kind: output, shape index: {}]  }
   0x1   :  { %v390_v0 = vld [vmem:[%s541_s1] sm:$0xff]   ;;  %347 = vmatprep.subr.bf16.mxu0 %v428_v1  ;;  %v391_v2 = vld [vmem:[%s541_s1 + $0x8] sm:$0xff]   ;;  %355 = vmatprep.subr.bf16.mxu1 %v428_v1  ;;  %v394_v7 = vld [vmem:[%s543_s3 + $0x10] sm:$0xff]  }
   0x2   :  { %348 = vmatpush3.bf16.msra.mxu0 %v390_v0  ;;  %351 = vmatprep.mubr.msk.bf16.mxu0 %vm429_vm0, %v428_v1  ;;  %v28_v3 = vld [vmem:[%s540_s0] sm:$0xff]  ;;  %v393_v6 = vld [vmem:[%s543_s3 + $0x8] sm:$0xff]  }
   0x3   :  { %349 = vmatprep.subr.bf16.mxu0 %v428_v1  ;;  %v392_v4 = vld [vmem:[%s543_s3] sm:$0xff]   ;;  %371 = vmatprep.mubr.msk.bf16.mxu1 %vm429_vm0, %v428_v1  ;;  %v29_v5 = vpack.c.bf16 %v28_v3, %v28_v3 }
   0x4   :  { %356 = vmatpush3.bf16.msra.mxu1 %v392_v4 }
   0x5   :  { %357 = vmatprep.subr.bf16.mxu1 %v428_v1 }
   0x6   :  { %350 = vmatpush3.bf16.msra.mxu0 %v391_v2 }
   0x7   :  { %375 = vmatprep.subr.bf16.mxu0 %v428_v1 }
   0x8   :  { %358 = vmatpush3.bf16.msra.mxu1 %v393_v6 }
   0x9   :  { %352 = vmatmul.mubr.msk.bf16.vlgmr.msra.gmra.mrb[0].mxu0 %vm53_vm1, %v29_v5  ;;  %359 = vmatprep.subr.bf16.mxu1 %v428_v1 }
   0xa   :  { %383 = vmatprep.mubr.msk.bf16.mxu0 %vm429_vm0, %v428_v1 }
   0xb   :  { %12 = vsyncpa [#allocation3], 0  ;;  %v395_v8 = vld [vmem:[%s543_s3 + $0x18] sm:$0xff]   ;;  %v396_v9 = vld [vmem:[%s543_s3 + $0x20] sm:$0xff]   ;;  %vm251_vm2 = vcmask 523264   ;;  %s430_s1 = smov [#allocation2]  }
   0xc   :  { %360 = vmatpush3.bf16.msra.mxu1 %v394_v7  ;;  %v397_v10 = vld [vmem:[%s543_s3 + $0x28] sm:$0xff]   ;;  %v398_v11 = vld [vmem:[%s543_s3 + $0x30] sm:$0xff]   ;;  %v399_v12 = vld [vmem:[%s543_s3 + $0x38] sm:$0xff]   ;;  %vm295_vm3 = vcmask 130048  }
   0xd   :  { %361 = vmatprep.subr.bf16.mxu1 %v428_v1  ;;  %v400_v13 = vld [vmem:[%s545_s5] sm:$0xff]   ;;  %v401_v14 = vld [vmem:[%s545_s5 + $0x8] sm:$0xff]   ;;  %v402_v23 = vld [vmem:[%s545_s5 + $0x10] sm:$0xff]  }
   0xe   :  { %376 = vmatpush3.bf16.msra.mxu0 %v400_v13  ;;  %v311_v15 = vld [vmem:[%s542_s2] ss:$0 sm:$0xff]  ;;  %v403_v24 = vld [vmem:[%s545_s5 + $0x18] sm:$0xff]   ;;  %s303_s5 = sshll.u32 %s430_s1, 4  ;;  %s304_s5 = int_to_ptr.vmem [resolvable:$true] %s303_s5 }
   0xf   :  { %377 = vmatprep.subr.bf16.mxu0 %v428_v1  ;;  %v315_v25 = vld [vmem:[%s544_s4] ss:$0 sm:$0xff]  ;;  %s404_s4 = scalar_lea.vmem %s304_s5, 128  ;;  %p409_p1 = scmp.lt.s32.totalorder %s304_s5, %s304_s5 }
  0x10   :  { %362 = vmatpush3.bf16.msra.mxu1 %v395_v8  ;;  %v324_v33 = vld [vmem:[%s546_s6] ss:$0 sm:$0xff]  ;;  %p405_p0 = scmp.ne.s32.totalorder %s304_s5, %s404_s4  ;;  %p410_p2 = scmp.lt.s32.totalorder %s404_s4, %s404_s4 }
  0x11   :  { %363 = vmatprep.subr.bf16.mxu1 %v428_v1 }
  0x12   :  { %378 = vmatpush3.bf16.msra.mxu0 %v401_v14  ;;  %p411_p3 = por %p410_p2, %p409_p1 }
  0x13   :  { %379 = vmatprep.subr.bf16.mxu0 %v428_v1 }
  0x14   :  { %364 = vmatpush3.bf16.msra.mxu1 %v396_v9  ;;  %p412_p4 = pnand %p411_p3, %p405_p0 }
  0x15   :  { %365 = vmatprep.subr.bf16.mxu1 %v428_v1 }
  0x16   :  { %380 = vmatpush3.bf16.msra.mxu0 %v402_v23 }
  0x17   :  { %381 = vmatprep.subr.bf16.mxu0 %v428_v1 }
  0x18   :  { %366 = vmatpush3.bf16.msra.mxu1 %v397_v10 }
  0x19   :  { %367 = vmatprep.subr.bf16.mxu1 %v428_v1 }
  0x1a   :  { %382 = vmatpush3.bf16.msra.mxu0 %v403_v24 }
  0x1c   :  { %368 = vmatpush3.bf16.msra.mxu1 %v398_v11 }
  0x1d   :  { %369 = vmatprep.subr.bf16.mxu1 %v428_v1 }
  0x20   :  { %370 = vmatpush3.bf16.msra.mxu1 %v399_v12 }
  0xdc   :  { %v91_v16 = vpop.f32.mrb[0].mxu0 }
  0xdd   :  { %v92_v17 = vadd.f32 %v311_v15, %v91_v16  ;;  %v353_v18 = vpop.f32.mrb[1].mxu0 }
  0xde   :  { %v94_v19 = vpop.f32.mrb[2].mxu0 }
  0xdf   :  { %v97_v20 = vmax.f32 %v92_v17, 0.0  ;;  %v354_v21 = vpop.f32.mrb[3].mxu0 }
  0xe1   :  { %v98_v22 = vpack.c.bf16 %v97_v20, %v97_v20 }
  0xe3   :  { %372 = vmatmul.mubr.bf16.vlgmr.msra.gmra.mrb[0].mxu1 %v98_v22 }
 0x1b6   :  { %v204_v26 = vpop.f32.mrb[0].mxu1 }
 0x1b7   :  { %v205_v27 = vadd.f32 %v315_v25, %v204_v26  ;;  %v373_v28 = vpop.f32.mrb[1].mxu1 }
 0x1b8   :  { %v207_v29 = vpop.f32.mrb[2].mxu1 }
 0x1b9   :  { %v210_v30 = vmax.f32 %v205_v27, 0.0  ;;  %v374_v31 = vpop.f32.mrb[3].mxu1 }
 0x1bb   :  { %v211_v32 = vpack.c.bf16 %v210_v30, %v210_v30 }
 0x1bd   :  { %384 = vmatmul.mubr.msk.bf16.vlgmr.msra.gmra.mrb[4].mxu0 %vm251_vm2, %v211_v32 }
 0x290   :  { %v289_v34 = vpop.f32.mrb[4].mxu0 }
 0x291   :  { %v290_v35 = vadd.f32 %v324_v33, %v289_v34  ;;  %v385_v36 = vpop.f32.mrb[5].mxu0 }
 0x292   :  { %v292_v37 = vpop.f32.mrb[6].mxu0 }
 0x293   :  { %v386_v38 = vpop.f32.mrb[7].mxu0  ;;  %296 = vst.msk [vmem:[#allocation2] sm:$0xff] %vm295_vm3, %v290_v35 }
 0x294   :  { %415 = shalt.err (!%p412_p4)
}
 0x295   :  { %s416_s6 = scalar_lea.hbm %s547_s7, 128 }
 0x296   :  { %p417_p5 = scmp.ne.s32.totalorder %s547_s7, %s416_s6  ;;  %p420_p6 = scmp.lt.u32.totalorder %s416_s6, %s547_s7 }
 0x298   :  { %p422_p7 = pnand %p420_p6, %p417_p5 }
 0x29a   :  { %425 = shalt.err (!%p422_p7)
}
 0x29b   :  { %306 = dma.vmem_to_hbm [thread:$0]  %s304_s5, 128, %s547_s7, [#allocation3]  }
 0x29c   :  { %426 = dma.done.wait [#allocation3], 128  }
 0x29d   :  { %427 = vsyncadd [#allocation3], 4294967168 }
 0x29e   :  { %310 = vsyncpa [#allocation3], 1 }

</bundles_post_ra>
